<compile_context>
chip_gen: v7x
topology: tpu7x:2x2x1
jax: 0.10.0
libtpu: 0.0.40
codegen_flags: <defaults>
</compile_context>

<pallas_src>
import jax
import jax.numpy as jnp
from jax.experimental import pallas as pl
from jax.experimental.pallas import tpu as pltpu


_LANES = 128
_SUBLANES = 8


def _mape_kernel(inp_ref, tgt_ref, out_ref):
    inp = inp_ref[...].astype(jnp.float32)
    tgt = tgt_ref[...].astype(jnp.float32)
    # abs((target - input) / target); reciprocal lowers to the EUP slot, so it
    # rides along for free while the kernel is HBM-bandwidth bound.
    ape = jnp.abs((tgt - inp) * pl.reciprocal(tgt, approx=False))
    tr, lanes = inp_ref.shape
    # Sublane-aligned partial reduction: (tr, 128) -> (tr//8, 8, 128) -> (8, 128).
    # This is tr//8 vreg-wise VALU adds; the single expensive cross-lane /
    # cross-sublane scalar reduction happens once, outside the kernel.
    out_ref[...] = ape.reshape(tr // _SUBLANES, _SUBLANES, lanes).sum(axis=0)


def mape_loss(input_arr: jax.Array, target_arr: jax.Array,
              *, max_tile_rows: int = 4096) -> jax.Array:
    """Pallas MAPE loss. Returns a scalar f32: mean(abs((t - x) / t))."""
    assert input_arr.shape == target_arr.shape
    n = int(input_arr.size)
    assert n > 0

    x = input_arr.reshape(-1)
    t = target_arr.reshape(-1)

    # Row geometry: pad element count to rows*128 with rows a multiple of the
    # tile height (itself a multiple of 8 sublanes).
    rows_raw = -(-n // _LANES)
    rows_aligned = -(-rows_raw // _SUBLANES) * _SUBLANES
    tr = min(max_tile_rows, rows_aligned)
    num_blocks = -(-rows_aligned // tr)
    rows = num_blocks * tr
    padded = rows * _LANES

    if padded != n:
        pad = padded - n
        # (input=1, target=1) -> abs((1-1)/1) == 0: zero contribution to sum.
        x = jnp.concatenate([x, jnp.ones((pad,), dtype=x.dtype)])
        t = jnp.concatenate([t, jnp.ones((pad,), dtype=t.dtype)])

    x2 = x.reshape(rows, _LANES)
    t2 = t.reshape(rows, _LANES)

    partials = pl.pallas_call(
        _mape_kernel,
        out_shape=jax.ShapeDtypeStruct((num_blocks * _SUBLANES, _LANES),
                                       jnp.float32),
        grid_spec=pltpu.PrefetchScalarGridSpec(
            num_scalar_prefetch=0,
            grid=(num_blocks,),
            in_specs=[
                pl.BlockSpec((tr, _LANES), lambda i: (i, 0)),
                pl.BlockSpec((tr, _LANES), lambda i: (i, 0)),
            ],
            out_specs=pl.BlockSpec((_SUBLANES, _LANES), lambda i: (i, 0)),
        ),
        compiler_params=pltpu.CompilerParams(
            # Independent per-block partial sums: megacore-shardable on v7x.
            dimension_semantics=("parallel",),
            # Explicit VMEM budget: above the v5e 16 MiB scoped default, well
            # below the v7x 64 MiB physical ceiling.
            vmem_limit_bytes=32 * 1024 * 1024,
        ),
    )(x2, t2)

    # Tiny final reduction + mean. n is a trace-time Python int (exact).
    return jnp.sum(partials) / jnp.float32(n)


if __name__ == "__main__":
    key = jax.random.PRNGKey(0)
    k1, k2, k3, k4 = jax.random.split(key, 4)

    # Small shapes consistent with a regression loss: batch of predictions vs
    # targets. Keep targets away from zero so the reference division is sane.
    shape = (32, 128)
    input_arr = jax.random.normal(k1, shape, dtype=jnp.float32)
    target_arr = jax.random.uniform(k2, shape, dtype=jnp.float32,
                                    minval=0.5, maxval=2.0)

    loss = jax.block_until_ready(mape_loss(input_arr, target_arr))
    ref = jnp.mean(jnp.abs((target_arr - input_arr) / target_arr))
    assert jnp.allclose(loss, ref, rtol=1e-5, atol=1e-6), (loss, ref)

    # Second check: non-128-multiple element count exercises the padding path.
    shape2 = (7, 33)
    inp2 = jax.random.normal(k3, shape2, dtype=jnp.float32)
    tgt2 = jax.random.uniform(k4, shape2, dtype=jnp.float32,
                              minval=0.5, maxval=2.0)
    loss2 = jax.block_until_ready(mape_loss(inp2, tgt2))
    ref2 = jnp.mean(jnp.abs((tgt2 - inp2) / tgt2))
    assert jnp.allclose(loss2, ref2, rtol=1e-5, atol=1e-6), (loss2, ref2)

    print("KERNEL_OK")
</pallas_src>

<mosaic_0001>
module attributes {stable_mosaic.version = 11 : i64} {
  func.func @_mape_kernel(%arg0: i32, %arg1: memref<32x128xf32, #tpu.memory_space<vmem>>, %arg2: memref<32x128xf32, #tpu.memory_space<vmem>>, %arg3: memref<8x128xf32, #tpu.memory_space<vmem>>) attributes {dimension_semantics = [#tpu.dimension_semantics<parallel>], iteration_bounds = array<i64: 1>, scalar_prefetch = 0 : i64, scratch_operands = 0 : i64, tpu.core_type = #tpu.core_type<tc>, window_params = [{transform_indices = @transform_0, window_bounds = array<i64: 32, 128>}, {transform_indices = @transform_1, window_bounds = array<i64: 32, 128>}, {transform_indices = @transform_2, window_bounds = array<i64: 8, 128>}]} {
    %c0 = arith.constant 0 : index
    %c0_0 = arith.constant 0 : index
    %0 = vector.load %arg1[%c0, %c0_0] : memref<32x128xf32, #tpu.memory_space<vmem>>, vector<32x128xf32>
    %c0_1 = arith.constant 0 : index
    %c0_2 = arith.constant 0 : index
    %1 = vector.load %arg2[%c0_1, %c0_2] : memref<32x128xf32, #tpu.memory_space<vmem>>, vector<32x128xf32>
    %2 = arith.subf %1, %0 : vector<32x128xf32>
    %3 = tpu.reciprocal %1 : vector<32x128xf32> -> vector<32x128xf32>
    %4 = arith.mulf %2, %3 : vector<32x128xf32>
    %5 = math.absf %4 : vector<32x128xf32>
    %6 = vector.shape_cast %5 : vector<32x128xf32> to vector<4x8x128xf32>
    %cst = arith.constant dense<0.000000e+00> : vector<8x128xf32>
    %7 = vector.multi_reduction <add>, %6, %cst [0] : vector<4x8x128xf32> to vector<8x128xf32>
    %c0_3 = arith.constant 0 : index
    %c0_4 = arith.constant 0 : index
    %8 = vector.load %arg3[%c0_3, %c0_4] : memref<8x128xf32, #tpu.memory_space<vmem>>, vector<8x128xf32>
    tpu.vector_store %arg3[%c0_3, %c0_4], %7 {strides = array<i32>} : memref<8x128xf32, #tpu.memory_space<vmem>>, vector<8x128xf32>,
    return
  }
  func.func @transform_0(%arg0: i32) -> (i32, i32) {
    %c0_i32 = arith.constant 0 : i32
    %c0_i32_0 = arith.constant 0 : i32
    return %arg0, %c0_i32 : i32, i32
  }
  func.func @transform_1(%arg0: i32) -> (i32, i32) {
    %c0_i32 = arith.constant 0 : i32
    %c0_i32_0 = arith.constant 0 : i32
    return %arg0, %c0_i32 : i32, i32
  }
  func.func @transform_2(%arg0: i32) -> (i32, i32) {
    %c0_i32 = arith.constant 0 : i32
    %c0_i32_0 = arith.constant 0 : i32
    return %arg0, %c0_i32 : i32, i32
  }
}

</mosaic_0001>

<bundles_post_ra>
// kernel: tpu_custom_call.1
= control target key start
LH: loop header
LB: loop body
LE: loop exit
PB: predicated region body
PF: predicated region fallthrough
CT: control target
= control target key end

     0   :  { %7 = vsyncpa [#allocation3], 0  ;;  %s225_s0 = inlined_call_operand.hbm [shape: f32[32,128], index: 0, kind: input, shape index: {}]   ;;  %s226_s1 = inlined_call_operand.hbm [shape: f32[32,128], index: 1, kind: input, shape index: {}]   ;;  %s227_s2 = inlined_call_operand.hbm [shape: f32[8,128], index: 2, kind: output, shape index: {}]  }
   0x1   :  { %8 = vsyncpa [#allocation6], 0 }
   0x2   :  { %9 = vsyncpa [#allocation4], 0  ;;  %s169_s9 = smov [#allocation2]   ;;  %s97_s13 = scalar_lea.hbm %s225_s0, 512 }
   0x3   :  { %s15_s10 = sshll.u32 %s169_s9, 4  ;;  %p98_p0 = scmp.ne.s32.totalorder %s225_s0, %s97_s13  ;;  %s16_s10 = int_to_ptr.vmem [resolvable:$true] %s15_s10 }
   0x4   :  { %p101_p1 = scmp.lt.u32.totalorder %s97_s13, %s225_s0 }
   0x6   :  { %p103_p2 = pnand %p101_p1, %p98_p0 }
   0x8   :  { %106 = shalt.err (!%p103_p2)
}
   0x9   :  { %s107_s18 = scalar_lea.vmem %s16_s10, 512  ;;  %p112_p4 = scmp.lt.s32.totalorder %s16_s10, %s16_s10 }
   0xa   :  { %p108_p3 = scmp.ne.s32.totalorder %s16_s10, %s107_s18  ;;  %p113_p5 = scmp.lt.s32.totalorder %s107_s18, %s107_s18 }
   0xc   :  { %p114_p6 = por %p113_p5, %p112_p4 }
   0xe   :  { %p115_p7 = pnand %p114_p6, %p108_p3 }
  0x10   :  { %118 = shalt.err (!%p115_p7)
}
  0x11   :  { %s170_s19 = smov 128   ;;  %s171_s20 = smov 8  }
  0x12   :  { %21 = dma.hbm_to_vmem [thread:$0]  %s225_s0, 512, %s16_s10, [#allocation3], %s170_s19, %s170_s19, %s171_s20  }
  0x13   :  { %s172_s23 = smov [#allocation5]   ;;  %s119_s27 = scalar_lea.hbm %s226_s1, 512 }
  0x14   :  { %s27_s24 = sshll.u32 %s172_s23, 4  ;;  %p120_p8 = scmp.ne.s32.totalorder %s226_s1, %s119_s27  ;;  %s28_s24 = int_to_ptr.vmem [resolvable:$true] %s27_s24 }
  0x15   :  { %p123_p9 = scmp.lt.u32.totalorder %s119_s27, %s226_s1 }
  0x17   :  { %p125_p10 = pnand %p123_p9, %p120_p8 }
  0x19   :  { %128 = shalt.err (!%p125_p10)
}
  0x1a   :  { %s129_s4 = scalar_lea.vmem %s28_s24, 512  ;;  %p134_p12 = scmp.lt.s32.totalorder %s28_s24, %s28_s24 }
  0x1b   :  { %p130_p11 = scmp.ne.s32.totalorder %s28_s24, %s129_s4  ;;  %p135_p13 = scmp.lt.s32.totalorder %s129_s4, %s129_s4 }
  0x1d   :  { %p136_p0 = por %p135_p13, %p134_p12 }
  0x1f   :  { %p137_p1 = pnand %p136_p0, %p130_p11 }
  0x21   :  { %140 = shalt.err (!%p137_p1)
}
  0x22   :  { %33 = dma.hbm_to_vmem [thread:$0]  %s226_s1, 512, %s28_s24, [#allocation6], %s170_s19, %s170_s19, %s171_s20  }
  0x23   :  { %163 = dma.done.wait [#allocation3], 512  }
  0x24   :  { %164 = vsyncadd [#allocation3], 4294966784 }
  0x25   :  { %165 = dma.done.wait [#allocation6], 512  }
  0x26   :  { %166 = vsyncadd [#allocation6], 4294966784  ;;  %v44_v0 = vld [vmem:[#allocation5] sm:$0xff]  ;;  %v45_v1 = vld [vmem:[#allocation5 + $0x8] sm:$0xff]  ;;  %s173_s1 = smov [#allocation7]  }
  0x27   :  { %v46_v2 = vld [vmem:[#allocation5 + $0x10] sm:$0xff]  ;;  %v47_v3 = vld [vmem:[#allocation5 + $0x18] sm:$0xff]  ;;  %89 = vrcp.f32 %v44_v0  ;;  %v40_v4 = vld [vmem:[#allocation2] sm:$0xff]  ;;  %s74_s6 = sshll.u32 %s173_s1, 4  ;;  %s75_s6 = int_to_ptr.vmem [resolvable:$true] %s74_s6 }
  0x28   :  { %91 = vrcp.f32 %v45_v1  ;;  %v41_v5 = vld [vmem:[#allocation2 + $0x8] sm:$0xff]  ;;  %v42_v6 = vld [vmem:[#allocation2 + $0x10] sm:$0xff]  ;;  %v43_v7 = vld [vmem:[#allocation2 + $0x18] sm:$0xff]  ;;  %v48_v8 = vsub.f32 %v44_v0, %v40_v4  ;;  %s141_s7 = scalar_lea.vmem %s75_s6, 128  ;;  %p146_p3 = scmp.lt.s32.totalorder %s75_s6, %s75_s6 }
  0x29   :  { %93 = vrcp.f32 %v46_v2  ;;  %v49_v9 = vsub.f32 %v45_v1, %v41_v5  ;;  %v50_v10 = vsub.f32 %v46_v2, %v42_v6  ;;  %v51_v12 = vsub.f32 %v47_v3, %v43_v7  ;;  %p142_p2 = scmp.ne.s32.totalorder %s75_s6, %s141_s7  ;;  %p147_p4 = scmp.lt.s32.totalorder %s141_s7, %s141_s7 }
  0x2a   :  { %95 = vrcp.f32 %v47_v3 }
  0x2b   :  { %p148_p5 = por %p147_p4, %p146_p3 }
  0x2d   :  { %p149_p6 = pnand %p148_p5, %p142_p2 }
  0x31   :  { %v90_v11 = vpop.eup %89 }
  0x32   :  { %v92_v13 = vpop.eup %91  ;;  %v56_v14 = vmul.f32 %v90_v11, %v48_v8 }
  0x33   :  { %v94_v15 = vpop.eup %93  ;;  %v57_v16 = vmul.f32 %v92_v13, %v49_v9 }
  0x34   :  { %v96_v17 = vpop.eup %95  ;;  %v58_v18 = vmul.f32 %v94_v15, %v50_v10  ;;  %v60_v19 = vand.u32 2147483647, %v56_v14 }
  0x35   :  { %v59_v20 = vmul.f32 %v96_v17, %v51_v12  ;;  %v61_v21 = vand.u32 2147483647, %v57_v16 }
  0x36   :  { %v62_v22 = vand.u32 2147483647, %v58_v18 }
  0x37   :  { %v63_v23 = vand.u32 2147483647, %v59_v20  ;;  %v64_v24 = vadd.f32 %v61_v21, %v60_v19 }
  0x39   :  { %v65_v25 = vadd.f32 %v64_v24, %v62_v22 }
  0x3b   :  { %v66_v26 = vadd.f32 %v65_v25, %v63_v23 }
  0x3d   :  { %67 = vst [vmem:[#allocation7] sm:$0xff] %v66_v26 }
  0x3e   :  { %152 = shalt.err (!%p149_p6)
}
  0x3f   :  { %s153_s10 = scalar_lea.hbm %s227_s2, 128 }
  0x40   :  { %p154_p7 = scmp.ne.s32.totalorder %s227_s2, %s153_s10  ;;  %p157_p8 = scmp.lt.u32.totalorder %s153_s10, %s227_s2 }
  0x42   :  { %p159_p9 = pnand %p157_p8, %p154_p7 }
  0x44   :  { %162 = shalt.err (!%p159_p9)
}
  0x45   :  { %77 = dma.vmem_to_hbm [thread:$0]  %s75_s6, 128, %s227_s2, [#allocation4]  }
  0x46   :  { %167 = dma.done.wait [#allocation4], 128  }
  0x47   :  { %168 = vsyncadd [#allocation4], 4294967168 }
  0x48   :  { %81 = vsyncpa [#allocation3], 1 }
  0x49   :  { %82 = vsyncpa [#allocation6], 1 }
  0x4a   :  { %83 = vsyncpa [#allocation4], 1 }

</bundles_post_ra>
